<compile_context>
chip_gen: v6e
topology: v6e:2x2x1
jax: 0.10.0
libtpu: 0.0.40
codegen_flags: <defaults>
</compile_context>

<pallas_src>
import jax
import jax.numpy as jnp
from jax import lax
from jax.experimental import pallas as pl
from jax.experimental.pallas import tpu as pltpu


# ---------------------------------------------------------------------------
# kernels
# ---------------------------------------------------------------------------

def _tile_partial_sum(batch_ref, x_ref, num_graphs):
    """Per-tile segment sum: (num_graphs, f_tile) f32 partial via MXU matmul."""
    x = x_ref[...]                                   # (tn, f_tile) native dtype
    b = batch_ref[...]                               # (tn, 1) int32 graph ids
    tn = x.shape[0]
    seg = lax.broadcasted_iota(jnp.int32, (tn, num_graphs), 1)
    onehot = (seg == b).astype(x.dtype)              # 0/1 exact in bf16 or f32
    return lax.dot_general(
        onehot, x,
        dimension_numbers=(((0,), (0,)), ((), ())),  # contract over node axis
        preferred_element_type=jnp.float32,
    )


def _pool_kernel_direct(batch_ref, x_ref, m_ref):
    """f32 output: accumulate straight into the VMEM-resident output block."""
    ni = pl.program_id(1)

    @pl.when(ni == 0)
    def _():
        m_ref[...] = jnp.zeros_like(m_ref)

    m_ref[...] += _tile_partial_sum(batch_ref, x_ref, m_ref.shape[0])


def _pool_kernel_acc(batch_ref, x_ref, m_ref, acc_ref):
    """non-f32 output: f32 scratch accumulator, cast once at the last node tile."""
    ni = pl.program_id(1)

    @pl.when(ni == 0)
    def _():
        acc_ref[...] = jnp.zeros_like(acc_ref)

    acc_ref[...] += _tile_partial_sum(batch_ref, x_ref, acc_ref.shape[0])

    @pl.when(ni == pl.num_programs(1) - 1)
    def _():
        m_ref[...] = acc_ref[...].astype(m_ref.dtype)


# ---------------------------------------------------------------------------
# tile sizing
# ---------------------------------------------------------------------------

def _round_up(a, b):
    return -(-a // b) * b


def _choose_f_tile(F):
    # Split the feature axis only when it is large and cleanly divisible,
    # so v7x's second TensorCore gets a "parallel" axis to work on.
    for cand in (512, 256, 128):
        if F > cand and F % cand == 0:
            return cand
    return F


def _choose_node_tile(N, f_tile, elt_bytes, num_graphs,
                      max_tile=2048, vmem_budget=24 * 1024 * 1024):
    """Largest power-of-2 node tile (<= max_tile) whose working set fits the budget."""
    lanes_f = _round_up(f_tile, 128)
    lanes_b = _round_up(num_graphs, 128)
    # output block (+ possible f32 scratch), both VMEM-resident for the whole grid
    acc_bytes = 2 * _round_up(num_graphs, 8) * lanes_f * 4
    tile = max_tile
    while tile > 8:
        x_bytes = 2 * tile * lanes_f * elt_bytes      # double-buffered x tile
        b_bytes = 2 * tile * 128 * 4                  # double-buffered batch ids
        oh_bytes = tile * lanes_b * 4                 # one-hot intermediate
        if x_bytes + b_bytes + oh_bytes + acc_bytes <= vmem_budget:
            break
        tile //= 2
    # do not pad a small graph batch up to a huge tile
    return max(8, min(tile, _round_up(N, 8)))


# ---------------------------------------------------------------------------
# wrapper == Origin.forward
# ---------------------------------------------------------------------------

def origin_forward(x, edge_index, batch, num_graphs, *, node_tile=None):
    """JAX/Pallas equivalent of Origin.forward(x, edge_index, batch)."""
    del edge_index  # unused by the reference module
    N, F = x.shape

    f_tile = _choose_f_tile(F)
    if node_tile is None:
        node_tile = _choose_node_tile(N, f_tile, x.dtype.itemsize, num_graphs)

    # Pad the node axis to a tile multiple. Padded rows get the sentinel graph id
    # == num_graphs, so their one-hot row is all zero and nothing is corrupted.
    N_pad = _round_up(N, node_tile)
    if N_pad != N:
        x_p = jnp.pad(x, ((0, N_pad - N), (0, 0)))
        batch_p = jnp.concatenate(
            [batch.astype(jnp.int32),
             jnp.full((N_pad - N,), num_graphs, dtype=jnp.int32)])
    else:
        x_p = x
        batch_p = batch.astype(jnp.int32)
    batch2d = batch_p.reshape(N_pad, 1)

    out_is_f32 = x.dtype == jnp.float32
    kernel = _pool_kernel_direct if out_is_f32 else _pool_kernel_acc
    scratch = [] if out_is_f32 else [pltpu.VMEM((num_graphs, f_tile), jnp.float32)]

    m = pl.pallas_call(
        kernel,
        out_shape=jax.ShapeDtypeStruct((num_graphs, F), x.dtype),
        grid_spec=pltpu.PrefetchScalarGridSpec(
            num_scalar_prefetch=0,
            grid=(F // f_tile, N_pad // node_tile),
            in_specs=[
                pl.BlockSpec((node_tile, 1), lambda fi, ni: (ni, 0)),
                pl.BlockSpec((node_tile, f_tile), lambda fi, ni: (ni, fi)),
            ],
            out_specs=pl.BlockSpec((num_graphs, f_tile), lambda fi, ni: (0, fi)),
            scratch_shapes=scratch,
        ),
        compiler_params=pltpu.CompilerParams(
            # F tiles are independent (megacore on v7x); node axis is a reduction.
            dimension_semantics=("parallel", "arbitrary"),
            vmem_limit_bytes=48 * 1024 * 1024,
        ),
    )(batch2d, x_p)

    # Second return value of the PyTorch forward is x itself (pure passthrough).
    return m, x


# ---------------------------------------------------------------------------
# self-test
# ---------------------------------------------------------------------------

if __name__ == "__main__":
    key = jax.random.PRNGKey(0)

    # --- test 1: float32, N a multiple of the tile (direct-accumulate path) ---
    N, F, B, E = 16, 32, 2, 20  # nodes, features, graphs, edges
    kx, ke, k2 = jax.random.split(key, 3)
    x = jax.random.normal(kx, (N, F), dtype=jnp.float32)
    edge_index = jax.random.randint(ke, (2, E), 0, N, dtype=jnp.int32)  # unused
    batch = jnp.concatenate([jnp.zeros(8, jnp.int32), jnp.ones(8, jnp.int32)])

    m, x_out = origin_forward(x, edge_index, batch, num_graphs=B)
    jax.block_until_ready((m, x_out))

    m_ref = jnp.zeros((B, F), jnp.float32).at[batch].add(x)
    assert jnp.allclose(m, m_ref, atol=1e-5, rtol=1e-5), "pooled output mismatch"
    assert jnp.array_equal(x_out, x), "passthrough mismatch"

    # --- test 2: bfloat16, ragged N (sentinel-padding + scratch-accumulator path) ---
    N2, B2 = 50, 3
    x2 = jax.random.normal(k2, (N2, F), dtype=jnp.bfloat16)
    batch2 = jnp.sort(
        jax.random.randint(jax.random.PRNGKey(1), (N2,), 0, B2, dtype=jnp.int32))

    m2, x2_out = origin_forward(x2, edge_index, batch2, num_graphs=B2)
    jax.block_until_ready((m2, x2_out))

    m2_ref = jnp.zeros((B2, F), jnp.float32).at[batch2].add(x2.astype(jnp.float32))
    assert jnp.allclose(m2.astype(jnp.float32), m2_ref, atol=1e-1, rtol=1e-2), \
        "bf16 pooled output mismatch"
    assert jnp.array_equal(x2_out, x2), "bf16 passthrough mismatch"

    print("KERNEL_OK")
</pallas_src>

<mosaic_0001>
module attributes {stable_mosaic.version = 11 : i64} {
  func.func @_pool_kernel_direct(%arg0: i32, %arg1: i32, %arg2: memref<16x1xi32, #tpu.memory_space<vmem>>, %arg3: memref<16x32xf32, #tpu.memory_space<vmem>>, %arg4: memref<2x32xf32, #tpu.memory_space<vmem>>) attributes {dimension_semantics = [#tpu.dimension_semantics<parallel>, #tpu.dimension_semantics<arbitrary>], iteration_bounds = array<i64: 1, 1>, scalar_prefetch = 0 : i64, scratch_operands = 0 : i64, tpu.core_type = #tpu.core_type<tc>, window_params = [{transform_indices = @transform_0, window_bounds = array<i64: 16, 1>}, {transform_indices = @transform_1, window_bounds = array<i64: 16, 32>}, {transform_indices = @transform_2, window_bounds = array<i64: 2, 32>}]} {
    %c0_i32 = arith.constant 0 : i32
    %0 = arith.cmpi eq, %arg1, %c0_i32 : i32
    %1 = arith.extui %0 : i1 to i32
    %c0_i32_0 = arith.constant 0 : i32
    %2 = arith.cmpi ne, %1, %c0_i32_0 : i32
    scf.if %2 {
      %cst_8 = arith.constant 0.000000e+00 : f32
      %14 = vector.broadcast %cst_8 : f32 to vector<2x32xf32>
      %c0_9 = arith.constant 0 : index
      %c0_10 = arith.constant 0 : index
      %15 = vector.load %arg4[%c0_9, %c0_10] : memref<2x32xf32, #tpu.memory_space<vmem>>, vector<2x32xf32>
      tpu.vector_store %arg4[%c0_9, %c0_10], %14 {strides = array<i32>} : memref<2x32xf32, #tpu.memory_space<vmem>>, vector<2x32xf32>,
    } else {
    }
    %c0 = arith.constant 0 : index
    %c0_1 = arith.constant 0 : index
    %3 = vector.load %arg4[%c0, %c0_1] : memref<2x32xf32, #tpu.memory_space<vmem>>, vector<2x32xf32>
    %c0_2 = arith.constant 0 : index
    %c0_3 = arith.constant 0 : index
    %4 = vector.load %arg3[%c0_2, %c0_3] : memref<16x32xf32, #tpu.memory_space<vmem>>, vector<16x32xf32>
    %c0_4 = arith.constant 0 : index
    %c0_5 = arith.constant 0 : index
    %5 = vector.load %arg2[%c0_4, %c0_5] : memref<16x1xi32, #tpu.memory_space<vmem>>, vector<16x1xi32>
    %6 = tpu.iota {dimensions = array<i32: 1>} : vector<16x2xi32>
    %7 = vector.broadcast %5 : vector<16x1xi32> to vector<16x2xi32>
    %8 = arith.cmpi eq, %6, %7 : vector<16x2xi32>
    %9 = arith.extui %8 : vector<16x2xi1> to vector<16x2xi32>
    %10 = arith.sitofp %9 : vector<16x2xi32> to vector<16x2xf32>
    %cst = arith.constant dense<0.000000e+00> : vector<2x32xf32>
    %11 = tpu.matmul %10, %4, %cst {dimension_numbers = #tpu.dot_dimension_numbers<[0], [0], [1], [1], [0, 1, 1, 1], [], []>} : vector<16x2xf32>, vector<16x32xf32>, vector<2x32xf32> -> vector<2x32xf32>
    %12 = arith.addf %3, %11 : vector<2x32xf32>
    %c0_6 = arith.constant 0 : index
    %c0_7 = arith.constant 0 : index
    %13 = vector.load %arg4[%c0_6, %c0_7] : memref<2x32xf32, #tpu.memory_space<vmem>>, vector<2x32xf32>
    tpu.vector_store %arg4[%c0_6, %c0_7], %12 {strides = array<i32>} : memref<2x32xf32, #tpu.memory_space<vmem>>, vector<2x32xf32>,
    return
  }
  func.func @transform_0(%arg0: i32, %arg1: i32) -> (i32, i32) {
    %c0_i32 = arith.constant 0 : i32
    %c0_i32_0 = arith.constant 0 : i32
    return %arg1, %c0_i32 : i32, i32
  }
  func.func @transform_1(%arg0: i32, %arg1: i32) -> (i32, i32) {
    %c0_i32 = arith.constant 0 : i32
    return %arg1, %arg0 : i32, i32
  }
  func.func @transform_2(%arg0: i32, %arg1: i32) -> (i32, i32) {
    %c0_i32 = arith.constant 0 : i32
    %c0_i32_0 = arith.constant 0 : i32
    return %c0_i32, %arg0 : i32, i32
  }
}

</mosaic_0001>

<bundles_post_ra>
// kernel: tpu_custom_call.1
= control target key start
LH: loop header
LB: loop body
LE: loop exit
PB: predicated region body
PF: predicated region fallthrough
CT: control target
= control target key end

     0   :  { %s236_s0 = inlined_call_operand.vmem [shape: s32[16,1], index: 0, kind: input, shape index: {}]   ;;  %s237_s1 = inlined_call_operand.vmem [shape: f32[16,32], index: 1, kind: input, shape index: {}]   ;;  %s238_s2 = inlined_call_operand.hbm [shape: f32[2,32], index: 2, kind: output, shape index: {}]  }
   0x1   :  { %v21_v0 = vld [vmem:[%s236_s0] sm:$0xff] }
   0x2   :  { %7 = vsyncpa [#allocation3], 0  ;;  %v200_v1 = vmov 0   ;;  %v201_v2 = vmov 0.0   ;;  %v22_v3 = vld [vmem:[%s236_s0 + $0x8] sm:$0xff]  ;;  %v19_v5 = vld [vmem:[%s237_s1] sm:$0xff]  ;;  %v23_v6 = vlaneseq }
   0x3   :  { %177 = vset.pattern.permute.xlu0 %v200_v1  ;;  %166 = vmatprep.subr.mxu0 %v201_v2  ;;  %v20_v4 = vld [vmem:[%s237_s1 + $0x8] sm:$0xff]  ;;  %vm202_vm0 = vmmov 0   ;;  %vm16_vm1 = vcmask 254976   ;;  %vm69_vm4 = vcmask 130048   ;;  %s203_s0 = smov [#allocation2]  }
   0x4   :  { %26 = vperm.xlu0 %177, %v21_v0   ;;  %167 = vmatpush3.msra.mxu0 %v20_v4  ;;  %v24_v7 = vand.u32 127, %v23_v6  ;;  %17 = vst.msk [vmem:[#allocation2] sm:$0x3] %vm16_vm1, %v201_v2  ;;  %s152_s1 = sshll.u32 %s203_s0, 4  ;;  %s153_s1 = int_to_ptr.vmem [resolvable:$true] %s152_s1 }
   0x5   :  { %170 = vmatprep.mubr.msk.f32.mxu0 %vm202_vm0, %v201_v2  ;;  %168 = vmatprep.subr.mxu0 %v201_v2  ;;  %s178_s17 = scalar_lea.vmem %s153_s1, 32  ;;  %p183_p1 = scmp.lt.s32.totalorder %s153_s1, %s153_s1 }
   0x6   :  { %169 = vmatpush3.msra.mxu0 %v19_v5  ;;  %p179_p0 = scmp.ne.s32.totalorder %s153_s1, %s178_s17  ;;  %p184_p2 = scmp.lt.s32.totalorder %s178_s17, %s178_s17 }
   0x8   :  { %29 = vperm.xlu0 %177, %v22_v3   ;;  %p185_p3 = por %p184_p2, %p183_p1 }
   0xa   :  { %p186_p4 = pnand %p185_p3, %p179_p0 }
   0xb   :  { %v18_v13 = vld [vmem:[#allocation2] sm:$0x3] }
  0x7f   :  { %v27_v8 = vpop.permute.xlu0 %26 }
  0x80   :  { %vm31_vm2 = vcmp.eq.s32.totalorder %v24_v7, %v27_v8 }
  0x81   :  { %v160_v9 = vsel %vm31_vm2, 1.0, %v201_v2 }
  0x82   :  { %37 = vxpose.xlu1.b32.start [1/2] (short) (narrow) %v160_v9, 8 }
  0x83   :  { %v30_v10 = vpop.permute.xlu0 %29 }
  0x84   :  { %vm32_vm3 = vcmp.eq.s32.totalorder %v24_v7, %v30_v10 }
  0x85   :  { %v161_v11 = vsel %vm32_vm3, 1.0, %v201_v2 }
  0x86   :  { %38 = vxpose.xlu1.b32.end [2/2] (short) (narrow) %v161_v11, 8 }
  0xfe   :  { %v53_v12 = vpop.trf.xlu1 }
  0xff   :  { %171 = vmatmul.mubr.msk.f32.vlgmr.msra.gmra.mxu0 %vm69_vm4, %v53_v12 }
 0x1bf   :  { %v139_v14 = vpop.f32.mrf.mxu0 }
 0x1c0   :  { %v143_v15 = vadd.f32 %v139_v14, %v18_v13 }
 0x1c1   :  { %v172_v16 = vpop.f32.mrf.mxu0 }
 0x1c2   :  { %145 = vst.msk [vmem:[#allocation2] sm:$0x3] %vm16_vm1, %v143_v15 }
 0x1c3   :  { %189 = shalt.err (!%p186_p4)
}
 0x1c4   :  { %155 = dma.vmem_to_hbm [thread:$0]  %s153_s1, 32, %s238_s2, [#allocation3]  }
 0x1c5   :  { %198 = dma.done.wait [#allocation3], 32  }
 0x1c6   :  { %199 = vsyncadd [#allocation3], 4294967264 }
 0x1c7   :  { %159 = vsyncpa [#allocation3], 1 }

</bundles_post_ra>
